<compile_context>
chip_gen: v6e
topology: v6e:2x2x1
jax: 0.10.0
libtpu: 0.0.40
codegen_flags: <defaults>
</compile_context>

<pallas_src>
import functools

import jax
import jax.numpy as jnp
import numpy as np
from jax import lax
from jax.experimental import pallas as pl
from jax.experimental.pallas import tpu as pltpu

EPSILON = 1e-10


def _pow(x, gamma):
    g = float(gamma)
    if g.is_integer():
        return lax.integer_pow(x, int(g))
    # Non-integer gamma: clamp the base at 0 so the +EPSILON on pt cannot push
    # (1 - pt) infinitesimally negative and produce NaN (latent issue in the
    # PyTorch reference as well).
    return jnp.power(jnp.maximum(x, 0.0), g)


def _focal_kernel(x_ref, t_ref, a_ref, asum_ref, fsum_ref, *,
                  gamma, smooth, total_rows, block_rows):
    i = pl.program_id(0)

    @pl.when(i == 0)
    def _init():
        asum_ref[...] = jnp.zeros_like(asum_ref)
        fsum_ref[...] = jnp.zeros_like(fsum_ref)

    x = x_ref[...].astype(jnp.float32)        # (TB, C) logits, upcast in VMEM
    t = t_ref[...]                            # (TB, 1) int32 targets
    alpha_row = a_ref[...]                    # (1, C)  float32 class weights

    # Row-wise softmax statistics.  The full (TB, C) probability tile is never
    # normalized: pt only needs sum(oh*e) / sum(e) per row (one divide/row).
    m = jnp.max(x, axis=-1, keepdims=True)
    e = jnp.exp(x - m)
    s = jnp.sum(e, axis=-1, keepdims=True)                     # (TB, 1)

    # one-hot of the target class
    cls = lax.broadcasted_iota(jnp.int32, x.shape, dimension=1)
    one_hot = (cls == t).astype(jnp.float32)                   # raw 0/1
    oh = one_hot
    if smooth:                                                 # clamp(oh, s, 1-s)
        oh = jnp.clip(one_hot, smooth, 1.0 - smooth)

    pt = jnp.sum(oh * e, axis=-1, keepdims=True) / s + EPSILON  # (TB, 1)
    logpt = jnp.log(pt)
    focal = _pow(1.0 - pt, gamma) * logpt                       # (TB, 1)

    # alpha[targets] gather expressed as a one-hot contraction
    alpha_g = jnp.sum(one_hot * alpha_row, axis=-1, keepdims=True)  # (TB, 1)

    # Mask the tail rows of the last (partial) tile so padding never
    # contributes (jnp.where selects, so garbage/NaN in dead rows is dropped).
    row = lax.broadcasted_iota(jnp.int32, (x.shape[0], 1), dimension=0)
    valid = (i * block_rows + row) < total_rows
    focal = jnp.where(valid, focal, 0.0)
    alpha_g = jnp.where(valid, alpha_g, 0.0)

    # Accumulate the two scalar sums into the resident (1,1) outputs.
    asum_ref[...] += jnp.sum(alpha_g, axis=0, keepdims=True)
    fsum_ref[...] += jnp.sum(focal, axis=0, keepdims=True)


def softmax_focal_loss(inputs, targets, alpha, *, gamma=2.0, smooth=0.0,
                       size_average=True, block_rows=512):
    """Forward of SoftmaxFocalLoss (2-D input path of the PyTorch module).

    inputs : (B, C) logits, any float dtype (streamed as-is, upcast in VMEM).
    targets: (B,) integer class ids.
    alpha  : (C, 1) or (C,) per-class weights (as built in __init__).
    """
    B, C = inputs.shape
    t2d = targets.reshape(B, 1).astype(jnp.int32)
    alpha_row = jnp.asarray(alpha, jnp.float32).reshape(1, C)

    # ---- tile-height selection -------------------------------------------
    # Large tiles amortize the ~0.35us per-grid-step overhead; cap the logits
    # tile at ~4 MiB per pipeline buffer so the double-buffered working set
    # stays well inside v7x's smaller (64 MiB physical / 32 MiB scoped) VMEM
    # even for vocabulary-sized C.
    itemsize = jnp.dtype(inputs.dtype).itemsize
    rows_cap = max(8, ((4 * 1024 * 1024) // max(1, C * itemsize)) // 8 * 8)
    eff = max(8, (min(int(block_rows), rows_cap) // 8) * 8)
    if eff >= B:
        eff = B                      # a single full-height tile is always legal
    grid = pl.cdiv(B, eff)

    kernel = functools.partial(_focal_kernel, gamma=float(gamma),
                               smooth=float(smooth), total_rows=B,
                               block_rows=eff)

    asum, fsum = pl.pallas_call(
        kernel,
        out_shape=(jax.ShapeDtypeStruct((1, 1), jnp.float32),
                   jax.ShapeDtypeStruct((1, 1), jnp.float32)),
        grid_spec=pltpu.PrefetchScalarGridSpec(
            num_scalar_prefetch=0,
            grid=(grid,),
            in_specs=[
                pl.BlockSpec((eff, C), lambda i: (i, 0)),   # logits tile
                pl.BlockSpec((eff, 1), lambda i: (i, 0)),   # targets tile
                pl.BlockSpec((1, C), lambda i: (0, 0)),     # alpha (replicated)
            ],
            out_specs=[
                pl.BlockSpec((1, 1), lambda i: (0, 0)),     # sum alpha[target]
                pl.BlockSpec((1, 1), lambda i: (0, 0)),     # sum (1-pt)^g*log(pt)
            ],
        ),
        # The grid axis reduces into the resident (1,1) accumulators, so it
        # must be "arbitrary".
        # TODO(synk): for v7x megacore one could emit per-tile partial sums
        # with a "parallel" axis instead; this kernel is HBM-bound so the
        # single-core accumulator form is kept for simplicity/legality.
        compiler_params=pltpu.CompilerParams(
            dimension_semantics=("arbitrary",)),
    )(inputs, t2d, alpha_row)

    # PyTorch broadcasts (B,1,1) * (B,) -> a (B,1,B) loss tensor with
    #   loss[i,0,j] = -alpha[t_i] * (1-pt_j)^gamma * log(pt_j),
    # so mean() = -(sum_i alpha_i)(sum_j focal_j)/B^2 and
    #    sum()  = -(sum_i alpha_i)(sum_j focal_j).
    prod = asum[0, 0] * fsum[0, 0]
    if size_average:
        return -prod / float(B * B)
    return -prod


def _reference_loss(inputs, targets, alpha, gamma, smooth, size_average):
    """Pure-JAX transcription of the PyTorch forward (2-D input path)."""
    B, C = inputs.shape
    p = jax.nn.softmax(inputs.astype(jnp.float32), axis=-1)
    oh = jax.nn.one_hot(targets, C, dtype=jnp.float32)
    if smooth:
        oh = jnp.clip(oh, smooth, 1.0 - smooth)
    pt = jnp.sum(oh * p, axis=-1) + EPSILON                      # (B,)
    logpt = jnp.log(pt)
    a = jnp.asarray(alpha, jnp.float32).reshape(C, 1)[targets.reshape(-1, 1)]
    loss = -1.0 * a * (_pow(1.0 - pt, gamma) * logpt)            # (B, 1, B)
    return jnp.mean(loss) if size_average else jnp.sum(loss)


if __name__ == "__main__":
    C = 16                    # num_classes
    # deterministic alpha of shape (C, 1), normalized like the list branch
    # of SoftmaxFocalLoss.__init__
    alpha = jnp.arange(1, C + 1, dtype=jnp.float32).reshape(C, 1)
    alpha = alpha / alpha.sum()

    key = jax.random.PRNGKey(0)

    # Case 1: single full-height tile, mean reduction, label smoothing.
    B1 = 128
    k1, k2, key = jax.random.split(key, 3)
    x1 = jax.random.normal(k1, (B1, C), dtype=jnp.float32)
    t1 = jax.random.randint(k2, (B1,), 0, C, dtype=jnp.int32)
    loss1 = jax.block_until_ready(
        softmax_focal_loss(x1, t1, alpha, gamma=2.0, smooth=1e-4,
                           size_average=True))
    ref1 = _reference_loss(x1, t1, alpha, 2.0, 1e-4, True)
    np.testing.assert_allclose(np.asarray(loss1), np.asarray(ref1),
                               rtol=1e-5, atol=1e-6)

    # Case 2: multiple tiles + ragged tail (B not a multiple of the tile),
    # sum reduction, no smoothing.
    B2 = 200
    k3, k4, key = jax.random.split(key, 3)
    x2 = jax.random.normal(k3, (B2, C), dtype=jnp.float32)
    t2 = jax.random.randint(k4, (B2,), 0, C, dtype=jnp.int32)
    loss2 = jax.block_until_ready(
        softmax_focal_loss(x2, t2, alpha, gamma=2.0, smooth=0.0,
                           size_average=False, block_rows=64))
    ref2 = _reference_loss(x2, t2, alpha, 2.0, 0.0, False)
    np.testing.assert_allclose(np.asarray(loss2), np.asarray(ref2),
                               rtol=1e-5, atol=1e-6)

    print("KERNEL_OK")
</pallas_src>

<mosaic_0001>
module attributes {stable_mosaic.version = 11 : i64} {
  func.func @_focal_kernel(%arg0: i32, %arg1: memref<128x16xf32, #tpu.memory_space<vmem>>, %arg2: memref<128x1xi32, #tpu.memory_space<vmem>>, %arg3: memref<1x16xf32, #tpu.memory_space<vmem>>, %arg4: memref<1x1xf32, #tpu.memory_space<vmem>>, %arg5: memref<1x1xf32, #tpu.memory_space<vmem>>) attributes {dimension_semantics = [#tpu.dimension_semantics<arbitrary>], iteration_bounds = array<i64: 1>, scalar_prefetch = 0 : i64, scratch_operands = 0 : i64, tpu.core_type = #tpu.core_type<tc>, window_params = [{transform_indices = @transform_0, window_bounds = array<i64: 128, 16>}, {transform_indices = @transform_1, window_bounds = array<i64: 128, 1>}, {pipeline_mode = #tpu.pipeline_mode<synchronous>, transform_indices = @transform_2, window_bounds = array<i64: 1, 16>}, {pipeline_mode = #tpu.pipeline_mode<synchronous>, transform_indices = @transform_3, window_bounds = array<i64: 1, 1>}, {pipeline_mode = #tpu.pipeline_mode<synchronous>, transform_indices = @transform_4, window_bounds = array<i64: 1, 1>}]} {
    %c0_i32 = arith.constant 0 : i32
    %0 = arith.cmpi eq, %arg0, %c0_i32 : i32
    %1 = arith.extui %0 : i1 to i32
    %c0_i32_0 = arith.constant 0 : i32
    %2 = arith.cmpi ne, %1, %c0_i32_0 : i32
    scf.if %2 {
      %cst_26 = arith.constant 0.000000e+00 : f32
      %57 = vector.broadcast %cst_26 : f32 to vector<1x1xf32>
      %c0_27 = arith.constant 0 : index
      %c0_28 = arith.constant 0 : index
      %58 = vector.load %arg4[%c0_27, %c0_28] : memref<1x1xf32, #tpu.memory_space<vmem>>, vector<1x1xf32>
      tpu.vector_store %arg4[%c0_27, %c0_28], %57 {strides = array<i32>} : memref<1x1xf32, #tpu.memory_space<vmem>>, vector<1x1xf32>,
      %cst_29 = arith.constant 0.000000e+00 : f32
      %59 = vector.broadcast %cst_29 : f32 to vector<1x1xf32>
      %c0_30 = arith.constant 0 : index
      %c0_31 = arith.constant 0 : index
      %60 = vector.load %arg5[%c0_30, %c0_31] : memref<1x1xf32, #tpu.memory_space<vmem>>, vector<1x1xf32>
      tpu.vector_store %arg5[%c0_30, %c0_31], %59 {strides = array<i32>} : memref<1x1xf32, #tpu.memory_space<vmem>>, vector<1x1xf32>,
    } else {
    }
    %c0 = arith.constant 0 : index
    %c0_1 = arith.constant 0 : index
    %3 = vector.load %arg1[%c0, %c0_1] : memref<128x16xf32, #tpu.memory_space<vmem>>, vector<128x16xf32>
    %c0_2 = arith.constant 0 : index
    %c0_3 = arith.constant 0 : index
    %4 = vector.load %arg2[%c0_2, %c0_3] : memref<128x1xi32, #tpu.memory_space<vmem>>, vector<128x1xi32>
    %c0_4 = arith.constant 0 : index
    %c0_5 = arith.constant 0 : index
    %5 = vector.load %arg3[%c0_4, %c0_5] : memref<1x16xf32, #tpu.memory_space<vmem>>, vector<1x16xf32>
    %cst = arith.constant dense<0xFF800000> : vector<128xf32>
    %6 = vector.multi_reduction <maximumf>, %3, %cst [1] : vector<128x16xf32> to vector<128xf32>
    %7 = vector.shape_cast %6 : vector<128xf32> to vector<128x1xf32>
    %8 = vector.broadcast %7 : vector<128x1xf32> to vector<128x16xf32>
    %9 = arith.subf %3, %8 : vector<128x16xf32>
    %10 = math.exp %9 : vector<128x16xf32>
    %cst_6 = arith.constant dense<0.000000e+00> : vector<128xf32>
    %11 = vector.multi_reduction <add>, %10, %cst_6 [1] : vector<128x16xf32> to vector<128xf32>
    %12 = vector.shape_cast %11 : vector<128xf32> to vector<128x1xf32>
    %13 = tpu.iota {dimensions = array<i32: 1>} : vector<128x16xi32>
    %14 = vector.broadcast %4 : vector<128x1xi32> to vector<128x16xi32>
    %15 = arith.cmpi eq, %13, %14 : vector<128x16xi32>
    %16 = arith.extui %15 : vector<128x16xi1> to vector<128x16xi32>
    %17 = arith.sitofp %16 : vector<128x16xi32> to vector<128x16xf32>
    %cst_7 = arith.constant 9.99999974E-5 : f32
    %cst_8 = arith.constant 0.999899983 : f32
    %18 = vector.broadcast %cst_7 : f32 to vector<128x16xf32>
    %19 = arith.maximumf %18, %17 : vector<128x16xf32>
    %20 = vector.broadcast %cst_8 : f32 to vector<128x16xf32>
    %21 = arith.minimumf %20, %19 : vector<128x16xf32>
    %22 = arith.mulf %21, %10 : vector<128x16xf32>
    %cst_9 = arith.constant dense<0.000000e+00> : vector<128xf32>
    %23 = vector.multi_reduction <add>, %22, %cst_9 [1] : vector<128x16xf32> to vector<128xf32>
    %24 = vector.shape_cast %23 : vector<128xf32> to vector<128x1xf32>
    %25 = arith.divf %24, %12 : vector<128x1xf32>
    %cst_10 = arith.constant 1.000000e-10 : f32
    %26 = vector.broadcast %cst_10 : f32 to vector<128x1xf32>
    %27 = arith.addf %25, %26 : vector<128x1xf32>
    %28 = math.log %27 : vector<128x1xf32>
    %cst_11 = arith.constant 1.000000e+00 : f32
    %29 = vector.broadcast %cst_11 : f32 to vector<128x1xf32>
    %30 = arith.subf %29, %27 : vector<128x1xf32>
    %31 = arith.mulf %30, %30 : vector<128x1xf32>
    %32 = arith.mulf %31, %28 : vector<128x1xf32>
    %33 = vector.broadcast %5 : vector<1x16xf32> to vector<128x16xf32>
    %34 = arith.mulf %17, %33 : vector<128x16xf32>
    %cst_12 = arith.constant dense<0.000000e+00> : vector<128xf32>
    %35 = vector.multi_reduction <add>, %34, %cst_12 [1] : vector<128x16xf32> to vector<128xf32>
    %36 = vector.shape_cast %35 : vector<128xf32> to vector<128x1xf32>
    %37 = tpu.iota {dimensions = array<i32: 0>} : vector<128x1xi32>
    %c128_i32 = arith.constant 128 : i32
    %38 = arith.muli %arg0, %c128_i32 : i32
    %39 = vector.broadcast %38 : i32 to vector<128x1xi32>
    %40 = arith.addi %39, %37 : vector<128x1xi32>
    %c128_i32_13 = arith.constant 128 : i32
    %41 = vector.broadcast %c128_i32_13 : i32 to vector<128x1xi32>
    %42 = arith.cmpi slt, %40, %41 : vector<128x1xi32>
    %cst_14 = arith.constant 0.000000e+00 : f32
    %43 = vector.broadcast %cst_14 : f32 to vector<128x1xf32>
    %44 = arith.select %42, %32, %43 : vector<128x1xi1>, vector<128x1xf32>
    %cst_15 = arith.constant 0.000000e+00 : f32
    %45 = vector.broadcast %cst_15 : f32 to vector<128x1xf32>
    %46 = arith.select %42, %36, %45 : vector<128x1xi1>, vector<128x1xf32>
    %c0_16 = arith.constant 0 : index
    %c0_17 = arith.constant 0 : index
    %47 = vector.load %arg4[%c0_16, %c0_17] : memref<1x1xf32, #tpu.memory_space<vmem>>, vector<1x1xf32>
    %cst_18 = arith.constant dense<0.000000e+00> : vector<1xf32>
    %48 = vector.multi_reduction <add>, %46, %cst_18 [0] : vector<128x1xf32> to vector<1xf32>
    %49 = vector.shape_cast %48 : vector<1xf32> to vector<1x1xf32>
    %50 = arith.addf %47, %49 : vector<1x1xf32>
    %c0_19 = arith.constant 0 : index
    %c0_20 = arith.constant 0 : index
    %51 = vector.load %arg4[%c0_19, %c0_20] : memref<1x1xf32, #tpu.memory_space<vmem>>, vector<1x1xf32>
    tpu.vector_store %arg4[%c0_19, %c0_20], %50 {strides = array<i32>} : memref<1x1xf32, #tpu.memory_space<vmem>>, vector<1x1xf32>,
    %c0_21 = arith.constant 0 : index
    %c0_22 = arith.constant 0 : index
    %52 = vector.load %arg5[%c0_21, %c0_22] : memref<1x1xf32, #tpu.memory_space<vmem>>, vector<1x1xf32>
    %cst_23 = arith.constant dense<0.000000e+00> : vector<1xf32>
    %53 = vector.multi_reduction <add>, %44, %cst_23 [0] : vector<128x1xf32> to vector<1xf32>
    %54 = vector.shape_cast %53 : vector<1xf32> to vector<1x1xf32>
    %55 = arith.addf %52, %54 : vector<1x1xf32>
    %c0_24 = arith.constant 0 : index
    %c0_25 = arith.constant 0 : index
    %56 = vector.load %arg5[%c0_24, %c0_25] : memref<1x1xf32, #tpu.memory_space<vmem>>, vector<1x1xf32>
    tpu.vector_store %arg5[%c0_24, %c0_25], %55 {strides = array<i32>} : memref<1x1xf32, #tpu.memory_space<vmem>>, vector<1x1xf32>,
    return
  }
  func.func @transform_0(%arg0: i32) -> (i32, i32) {
    %c0_i32 = arith.constant 0 : i32
    %c0_i32_0 = arith.constant 0 : i32
    return %arg0, %c0_i32 : i32, i32
  }
  func.func @transform_1(%arg0: i32) -> (i32, i32) {
    %c0_i32 = arith.constant 0 : i32
    %c0_i32_0 = arith.constant 0 : i32
    return %arg0, %c0_i32 : i32, i32
  }
  func.func @transform_2(%arg0: i32) -> (i32, i32) {
    %c0_i32 = arith.constant 0 : i32
    %c0_i32_0 = arith.constant 0 : i32
    %c0_i32_1 = arith.constant 0 : i32
    return %c0_i32, %c0_i32_0 : i32, i32
  }
  func.func @transform_3(%arg0: i32) -> (i32, i32) {
    %c0_i32 = arith.constant 0 : i32
    %c0_i32_0 = arith.constant 0 : i32
    %c0_i32_1 = arith.constant 0 : i32
    return %c0_i32, %c0_i32_0 : i32, i32
  }
  func.func @transform_4(%arg0: i32) -> (i32, i32) {
    %c0_i32 = arith.constant 0 : i32
    %c0_i32_0 = arith.constant 0 : i32
    %c0_i32_1 = arith.constant 0 : i32
    return %c0_i32, %c0_i32_0 : i32, i32
  }
}

</mosaic_0001>

<bundles_post_ra>
// kernel: tpu_custom_call.1
= control target key start
LH: loop header
LB: loop body
LE: loop exit
PB: predicated region body
PF: predicated region fallthrough
CT: control target
= control target key end

     0   :  { %10 = vsyncpa [#allocation3], 0  ;;  %vm58_vm0 = vcmask 130048   ;;  %v918_v6 = vmov 0   ;;  %s1413_s0 = inlined_call_operand.vmem [shape: f32[128,16], index: 0, kind: input, shape index: {}]   ;;  %s1414_s1 = inlined_call_operand.vmem [shape: s32[128,1], index: 1, kind: input, shape index: {}]   ;;  %s1415_s2 = inlined_call_operand.vmem [shape: f32[1,16], index: 2, kind: input, shape index: {}]   ;;  %s1416_s3 = inlined_call_operand.hbm [shape: f32[1,1], index: 3, kind: output, shape index: {0}]   ;;  %s1417_s4 = inlined_call_operand.hbm [shape: f32[1,1], index: 4, kind: output, shape index: {1}]  }
   0x1   :  { %v950_v0 = vld [vmem:[%s1413_s0 + $0x10] sm:$0xff]  ;;  %v955_v1 = vld [vmem:[%s1413_s0] sm:$0xff]  ;;  %v960_v2 = vld [vmem:[%s1413_s0 + $0x18] sm:$0xff]  ;;  %777 = vset.pattern.permute.xlu1 %v918_v6  ;;  %776 = vset.pattern.permute.xlu0 %v918_v6 }
   0x2   :  { %v65_v3 = vsel %vm58_vm0, %v950_v0, -inf  ;;  %v59_v4 = vsel %vm58_vm0, %v955_v1, -inf  ;;  %v969_v5 = vld [vmem:[%s1413_s0 + $0x8] sm:$0xff]  ;;  %v68_v7 = vsel %vm58_vm0, %v960_v2, -inf  ;;  %v983_v10 = vld [vmem:[%s1413_s0 + $0x20] sm:$0xff]  ;;  %v992_v13 = vld [vmem:[%s1413_s0 + $0x38] sm:$0xff] }
   0x3   :  { %66 = vmax.xlane.f32.xlu1 %v65_v3  ;;  %60 = vmax.xlane.f32.xlu0 %v59_v4  ;;  %v62_v8 = vsel %vm58_vm0, %v969_v5, -inf  ;;  %v978_v9 = vld [vmem:[%s1413_s0 + $0x28] sm:$0xff]  ;;  %v71_v12 = vsel %vm58_vm0, %v983_v10, -inf  ;;  %v997_v14 = vld [vmem:[%s1413_s0 + $0x30] sm:$0xff] }
   0x4   :  { %v74_v11 = vsel %vm58_vm0, %v978_v9, -inf }
   0x7   :  { %69 = vmax.xlane.f32.xlu1 %v68_v7  ;;  %63 = vmax.xlane.f32.xlu0 %v62_v8 }
   0xb   :  { %75 = vmax.xlane.f32.xlu1 %v74_v11  ;;  %72 = vmax.xlane.f32.xlu0 %v71_v12 }
   0xc   :  { %11 = vsyncpa [#allocation5], 0  ;;  %v80_v15 = vsel %vm58_vm0, %v992_v13, -inf  ;;  %v77_v16 = vsel %vm58_vm0, %v997_v14, -inf  ;;  %v1006_v17 = vld [vmem:[%s1413_s0 + $0x48] sm:$0xff]  ;;  %v1011_v18 = vld [vmem:[%s1413_s0 + $0x40] sm:$0xff] }
   0xd   :  { %v86_v19 = vsel %vm58_vm0, %v1006_v17, -inf  ;;  %v83_v20 = vsel %vm58_vm0, %v1011_v18, -inf  ;;  %v1020_v21 = vld [vmem:[%s1413_s0 + $0x58] sm:$0xff]  ;;  %v1025_v22 = vld [vmem:[%s1413_s0 + $0x50] sm:$0xff]  ;;  %v1034_v25 = vld [vmem:[%s1413_s0 + $0x68] sm:$0xff] }
   0xe   :  { %v92_v23 = vsel %vm58_vm0, %v1020_v21, -inf  ;;  %v89_v24 = vsel %vm58_vm0, %v1025_v22, -inf  ;;  %v1039_v26 = vld [vmem:[%s1413_s0 + $0x60] sm:$0xff]  ;;  %v98_v27 = vsel %vm58_vm0, %v1034_v25, -inf  ;;  %v1048_v29 = vld [vmem:[%s1413_s0 + $0x78] sm:$0xff]  ;;  %v1053_v30 = vld [vmem:[%s1413_s0 + $0x70] sm:$0xff] }
   0xf   :  { %81 = vmax.xlane.f32.xlu1 %v80_v15  ;;  %78 = vmax.xlane.f32.xlu0 %v77_v16  ;;  %v95_v28 = vsel %vm58_vm0, %v1039_v26, -inf  ;;  %v104_v31 = vsel %vm58_vm0, %v1048_v29, -inf  ;;  %v101_v32 = vsel %vm58_vm0, %v1053_v30, -inf  ;;  %v42_v33 = vld [vmem:[%s1414_s1 + $0x8] sm:$0xff]  ;;  %v43_v34 = vld [vmem:[%s1414_s1 + $0x10] sm:$0xff]  ;;  %v41_v35 = vld [vmem:[%s1414_s1] sm:$0xff] }
  0x10   :  { %v44_v36 = vld [vmem:[%s1414_s1 + $0x18] sm:$0xff]  ;;  %v50_v37 = vld [vmem:[%s1414_s1 + $0x48] sm:$0xff]  ;;  %v45_v38 = vld [vmem:[%s1414_s1 + $0x20] sm:$0xff] }
  0x11   :  { %v52_v39 = vld [vmem:[%s1414_s1 + $0x58] sm:$0xff]  ;;  %v46_v40 = vld [vmem:[%s1414_s1 + $0x28] sm:$0xff]  ;;  %v47_v42 = vld [vmem:[%s1414_s1 + $0x30] sm:$0xff] }
  0x12   :  { %v54_v41 = vld [vmem:[%s1414_s1 + $0x68] sm:$0xff]  ;;  %v56_v43 = vld [vmem:[%s1414_s1 + $0x78] sm:$0xff]  ;;  %v49_v45 = vld [vmem:[%s1414_s1 + $0x40] sm:$0xff] }
  0x13   :  { %87 = vmax.xlane.f32.xlu1 %v86_v19  ;;  %84 = vmax.xlane.f32.xlu0 %v83_v20  ;;  %v48_v44 = vld [vmem:[%s1414_s1 + $0x38] sm:$0xff]  ;;  %v51_v46 = vld [vmem:[%s1414_s1 + $0x50] sm:$0xff]  ;;  %v53_v47 = vld [vmem:[%s1414_s1 + $0x60] sm:$0xff] }
  0x14   :  { %v55_v48 = vld [vmem:[%s1414_s1 + $0x70] sm:$0xff] }
  0x17   :  { %93 = vmax.xlane.f32.xlu1 %v92_v23  ;;  %90 = vmax.xlane.f32.xlu0 %v89_v24 }
  0x1b   :  { %99 = vmax.xlane.f32.xlu1 %v98_v27  ;;  %96 = vmax.xlane.f32.xlu0 %v95_v28 }
  0x1f   :  { %105 = vmax.xlane.f32.xlu1 %v104_v31  ;;  %102 = vmax.xlane.f32.xlu0 %v101_v32 }
  0x30   :  { %209 = vperm.xlu1 %777, %v42_v33  }
  0x34   :  { %212 = vperm.xlu1 %777, %v43_v34  }
  0x35   :  { %206 = vperm.xlu0 %776, %v41_v35  }
  0x38   :  { %215 = vperm.xlu1 %777, %v44_v36  }
  0x39   :  { %233 = vperm.xlu0 %776, %v50_v37  }
  0x3c   :  { %218 = vperm.xlu1 %777, %v45_v38  }
  0x3d   :  { %239 = vperm.xlu0 %776, %v52_v39  }
  0x40   :  { %221 = vperm.xlu1 %777, %v46_v40  }
  0x41   :  { %245 = vperm.xlu0 %776, %v54_v41  }
  0x44   :  { %224 = vperm.xlu1 %777, %v47_v42  }
  0x45   :  { %251 = vperm.xlu0 %776, %v56_v43  }
  0x48   :  { %227 = vperm.xlu1 %777, %v48_v44  }
  0x4c   :  { %230 = vperm.xlu1 %777, %v49_v45  }
  0x50   :  { %236 = vperm.xlu1 %777, %v51_v46  }
  0x54   :  { %242 = vperm.xlu1 %777, %v53_v47  }
  0x58   :  { %248 = vperm.xlu1 %777, %v55_v48  }
  0x8c   :  { %v67_v49 = vpop.xlane.xlu1 %66  ;;  %v61_v50 = vpop.xlane.xlu0 %60 }
  0x8d   :  { %v107_v51 = vsub.f32 %v955_v1, %v61_v50  ;;  %v109_v53 = vsub.f32 %v950_v0, %v67_v49 }
  0x8f   :  { %v123_v52 = vmul.f32 1.442695, %v107_v51  ;;  %v127_v60 = vmul.f32 1.442695, %v109_v53  ;;  %v919_v51 = vmov 0.0  }
  0x90   :  { %v70_v54 = vpop.xlane.xlu1 %69  ;;  %v64_v55 = vpop.xlane.xlu0 %63 }
  0x91   :  { %v110_v56 = vsub.f32 %v960_v2, %v70_v54  ;;  %v108_v57 = vsub.f32 %v969_v5, %v64_v55  ;;  %778 = vpow2.f32 %v123_v52 }
  0x93   :  { %v129_v58 = vmul.f32 1.442695, %v110_v56  ;;  %v125_v59 = vmul.f32 1.442695, %v108_v57 }
  0x94   :  { %v76_v61 = vpop.xlane.xlu1 %75  ;;  %v73_v62 = vpop.xlane.xlu0 %72 }
  0x95   :  { %780 = vpow2.f32 %v129_v58  ;;  %v112_v63 = vsub.f32 %v978_v9, %v76_v61  ;;  %v111_v1 = vsub.f32 %v983_v10, %v73_v62 }
  0x96   :  { %782 = vpow2.f32 %v125_v59 }
  0x97   :  { %v133_v3 = vmul.f32 1.442695, %v112_v63  ;;  %v131_v0 = vmul.f32 1.442695, %v111_v1  ;;  %784 = vpow2.f32 %v127_v60 }
  0x98   :  { %v82_v4 = vpop.xlane.xlu1 %81  ;;  %v79_v6 = vpop.xlane.xlu0 %78 }
  0x99   :  { %786 = vpow2.f32 %v133_v3  ;;  %v114_v2 = vsub.f32 %v992_v13, %v82_v4  ;;  %v113_v5 = vsub.f32 %v997_v14, %v79_v6 }
  0x9a   :  { %788 = vpow2.f32 %v131_v0 }
  0x9b   :  { %v137_v7 = vmul.f32 1.442695, %v114_v2  ;;  %v135_v8 = vmul.f32 1.442695, %v113_v5 }
  0x9c   :  { %v88_v11 = vpop.xlane.xlu1 %87  ;;  %v85_v12 = vpop.xlane.xlu0 %84 }
  0x9d   :  { %790 = vpow2.f32 %v137_v7  ;;  %v116_v9 = vsub.f32 %v1006_v17, %v88_v11  ;;  %v115_v10 = vsub.f32 %v1011_v18, %v85_v12 }
  0x9e   :  { %792 = vpow2.f32 %v135_v8  ;;  %v1117_v15 = vpop.eup %778 }
  0x9f   :  { %v141_v16 = vmul.f32 1.442695, %v116_v9  ;;  %v139_v19 = vmul.f32 1.442695, %v115_v10  ;;  %v155_v13 = vsel %vm58_vm0, %v1117_v15, 0.0 }
  0xa0   :  { %v94_v20 = vpop.xlane.xlu1 %93  ;;  %v91_v14 = vpop.xlane.xlu0 %90  ;;  %156 = vadd.xlane.f32.xlu1 %v155_v13 }
  0xa1   :  { %794 = vpow2.f32 %v141_v16  ;;  %v118_v23 = vsub.f32 %v1020_v21, %v94_v20  ;;  %v117_v24 = vsub.f32 %v1025_v22, %v91_v14  ;;  %v203_v22 = vlaneseq }
  0xa2   :  { %v1123_v27 = vpop.eup %780  ;;  %796 = vpow2.f32 %v139_v19 }
  0xa3   :  { %v783_v17 = vpop.eup %782  ;;  %v143_v18 = vmul.f32 1.442695, %v117_v24  ;;  %v164_v28 = vsel %vm58_vm0, %v1123_v27, 0.0  ;;  %v145_v31 = vmul.f32 1.442695, %v118_v23 }
  0xa4   :  { %v100_v32 = vpop.xlane.xlu1 %99  ;;  %v158_v33 = vsel %vm58_vm0, %v783_v17, 0.0  ;;  %v97_v34 = vpop.xlane.xlu0 %96  ;;  %165 = vadd.xlane.f32.xlu1 %v164_v28 }
  0xa5   :  { %v1128_v35 = vpop.eup %784  ;;  %159 = vadd.xlane.f32.xlu0 %v158_v33  ;;  %v119_v21 = vsub.f32 %v1039_v26, %v97_v34  ;;  %798 = vpow2.f32 %v143_v18  ;;  %v120_v40 = vsub.f32 %v1034_v25, %v100_v32  ;;  %v1140_v26 = vand.u32 127, %v203_v22 }
  0xa6   :  { %v1131_v36 = vpop.eup %786  ;;  %800 = vpow2.f32 %v145_v31  ;;  %v161_v42 = vsel %vm58_vm0, %v1128_v35, 0.0 }
  0xa7   :  { %v1133_v37 = vpop.eup %788  ;;  %v170_v38 = vsel %vm58_vm0, %v1131_v36, 0.0  ;;  %v147_v39 = vmul.f32 1.442695, %v119_v21  ;;  %v149_v48 = vmul.f32 1.442695, %v120_v40 }
  0xa8   :  { %v106_v41 = vpop.xlane.xlu1 %105  ;;  %171 = vadd.xlane.f32.xlu1 %v170_v38  ;;  %v103_v43 = vpop.xlane.xlu0 %102  ;;  %v167_v45 = vsel %vm58_vm0, %v1133_v37, 0.0 }
  0xa9   :  { %162 = vadd.xlane.f32.xlu0 %v161_v42  ;;  %802 = vpow2.f32 %v147_v39  ;;  %v121_v46 = vsub.f32 %v1053_v30, %v103_v43  ;;  %v122_v63 = vsub.f32 %v1048_v29, %v106_v41 }
  0xaa   :  { %v1142_v44 = vpop.eup %790  ;;  %804 = vpow2.f32 %v149_v48 }
  0xab   :  { %v1147_v47 = vpop.eup %792  ;;  %v176_v25 = vsel %vm58_vm0, %v1142_v44, 0.0  ;;  %v151_v53 = vmul.f32 1.442695, %v121_v46  ;;  %v153_v7 = vmul.f32 1.442695, %v122_v63 }
  0xac   :  { %v210_v49 = vpop.permute.xlu1 %209  ;;  %177 = vadd.xlane.f32.xlu1 %v176_v25  ;;  %v173_v30 = vsel %vm58_vm0, %v1147_v47, 0.0 }
  0xad   :  { %vm254_vm1 = vcmp.eq.s32.totalorder %v1140_v26, %v210_v49  ;;  %168 = vadd.xlane.f32.xlu0 %v167_v45  ;;  %806 = vpow2.f32 %v151_v53 }
  0xae   :  { %v1152_v50 = vpop.eup %794  ;;  %v1155_v52 = vsel %vm254_vm1, 1.0, %v919_v51  ;;  %808 = vpow2.f32 %v153_v7 }
  0xaf   :  { %v1159_v54 = vpop.eup %796  ;;  %v302_v55 = vmax.f32 %v1155_v52, 0.0001  ;;  %v182_v56 = vsel %vm58_vm0, %v1152_v50, 0.0 }
  0xb0   :  { %v213_v57 = vpop.permute.xlu1 %212  ;;  %183 = vadd.xlane.f32.xlu1 %v182_v56  ;;  %v207_v60 = vpop.permute.xlu0 %206  ;;  %v179_v61 = vsel %vm58_vm0, %v1159_v54, 0.0 }
  0xb1   :  { %v318_v58 = vmin.f32 %v302_v55, 0.9999  ;;  %vm255_vm2 = vcmp.eq.s32.totalorder %v1140_v26, %v213_v57  ;;  %174 = vadd.xlane.f32.xlu0 %v173_v30  ;;  %vm253_vm3 = vcmp.eq.s32.totalorder %v1140_v26, %v207_v60 }
  0xb2   :  { %v1166_v59 = vsel %vm255_vm2, 1.0, %v919_v51  ;;  %v1170_v62 = vpop.eup %798  ;;  %v1187_v11 = vsel %vm253_vm3, 1.0, %v919_v51  ;;  %vm22_vm2 = vcmask 0  }
  0xb3   :  { %v303_v1 = vmax.f32 %v1166_v59, 0.0001  ;;  %v185_v0 = vsel %vm58_vm0, %v1170_v62, 0.0  ;;  %v334_v4 = vmul.f32 %v783_v17, %v318_v58  ;;  %v1176_v6 = vpop.eup %800  ;;  %v301_v23 = vmax.f32 %v1187_v11, 0.0001 }
  0xb4   :  { %v216_v3 = vpop.permute.xlu1 %215  ;;  %186 = vadd.xlane.f32.xlu1 %v185_v0  ;;  %v188_v9 = vsel %vm58_vm0, %v1176_v6, 0.0  ;;  %v234_v20 = vpop.permute.xlu0 %233  ;;  %23 = vst.msk [vmem:[#allocation2] sm:$0x1] %vm22_vm2, %v919_v51  ;;  %24 = vst.msk [vmem:[#allocation4] sm:$0x1] %vm22_vm2, %v919_v51 }
  0xb5   :  { %v319_v2 = vmin.f32 %v303_v1, 0.9999  ;;  %vm256_vm4 = vcmp.eq.s32.totalorder %v1140_v26, %v216_v3  ;;  %180 = vadd.xlane.f32.xlu0 %v179_v61  ;;  %v352_v10 = vsel %vm58_vm0, %v334_v4, 0.0  ;;  %vm262_vm6 = vcmp.eq.s32.totalorder %v1140_v26, %v234_v20 }
  0xb6   :  { %v1181_v5 = vsel %vm256_vm4, 1.0, %v919_v51  ;;  %v1183_v29 = vpop.eup %802 }
  0xb7   :  { %v304_v8 = vmax.f32 %v1181_v5, 0.0001  ;;  %v335_v16 = vmul.f32 %v1128_v35, %v319_v2  ;;  %v191_v14 = vsel %vm58_vm0, %v1183_v29, 0.0  ;;  %v1203_v31 = vpop.eup %804  ;;  %v317_v35 = vmin.f32 %v301_v23, 0.9999 }
  0xb8   :  { %v219_v12 = vpop.permute.xlu1 %218  ;;  %189 = vadd.xlane.f32.xlu1 %v188_v9  ;;  %v240_v21 = vpop.permute.xlu0 %239  ;;  %v194_v39 = vsel %vm58_vm0, %v1203_v31, 0.0 }
  0xb9   :  { %v320_v19 = vmin.f32 %v304_v8, 0.9999  ;;  %vm257_vm5 = vcmp.eq.s32.totalorder %v1140_v26, %v219_v12  ;;  %353 = vadd.xlane.f32.xlu0 %v352_v10  ;;  %v355_v18 = vsel %vm58_vm0, %v335_v16, 0.0  ;;  %vm264_vm9 = vcmp.eq.s32.totalorder %v1140_v26, %v240_v21  ;;  %v1278_v21 = vld [vmem:[%s1415_s2] ss:$0 sm:$0xff]  ;;  %s920_s2 = smov [#allocation4]  }
  0xba   :  { %v1195_v13 = vsel %vm257_vm5, 1.0, %v919_v51  ;;  %v1210_v34 = vpop.eup %806  ;;  %v333_v53 = vmul.f32 %v1117_v15, %v317_v35  ;;  %v1233_v30 = vsel %vm264_vm9, 1.0, %v919_v51  ;;  %s743_s26 = sshll.u32 %s920_s2, 4  ;;  %s744_s26 = int_to_ptr.vmem [resolvable:$true] %s743_s26 }
  0xbb   :  { %v305_v24 = vmax.f32 %v1195_v13, 0.0001  ;;  %v336_v28 = vmul.f32 %v1123_v27, %v320_v19  ;;  %v1214_v27 = vsel %vm262_vm6, 1.0, %v919_v51  ;;  %v197_v45 = vsel %vm58_vm0, %v1210_v34, 0.0  ;;  %v1244_v3 = vpop.eup %808  ;;  %s874_s27 = scalar_lea.vmem %s744_s26, 16  ;;  %s878_s28 = scalar_lea.vmem %s744_s26, 32 }
  0xbc   :  { %v222_v17 = vpop.permute.xlu1 %221  ;;  %192 = vadd.xlane.f32.xlu1 %v191_v14  ;;  %v310_v46 = vmax.f32 %v1214_v27, 0.0001  ;;  %v246_v58 = vpop.permute.xlu0 %245  ;;  %v312_v61 = vmax.f32 %v1233_v30, 0.0001  ;;  %v349_v63 = vsel %vm58_vm0, %v333_v53, 0.0  ;;  %v200_v9 = vsel %vm58_vm0, %v1244_v3, 0.0  ;;  %p875_p0 = scmp.ne.s32.totalorder %s744_s26, %s874_s27  ;;  %p879_p1 = scmp.lt.s32.totalorder %s744_s26, %s744_s26 }
  0xbd   :  { %v321_v32 = vmin.f32 %v305_v24, 0.9999  ;;  %vm258_vm7 = vcmp.eq.s32.totalorder %v1140_v26, %v222_v17  ;;  %356 = vadd.xlane.f32.xlu0 %v355_v18  ;;  %v358_v40 = vsel %vm58_vm0, %v336_v28, 0.0  ;;  %vm266_vm12 = vcmp.eq.s32.totalorder %v1140_v26, %v246_v58  ;;  %p880_p2 = scmp.lt.s32.totalorder %s878_s28, %s874_s27 }
  0xbe   :  { %v1208_v33 = vsel %vm258_vm7, 1.0, %v919_v51  ;;  %v326_v57 = vmin.f32 %v310_v46, 0.9999  ;;  %v328_v8 = vmin.f32 %v312_v61, 0.9999  ;;  %v1258_v16 = vsel %vm266_vm12, 1.0, %v919_v51 }
  0xbf   :  { %v306_v22 = vmax.f32 %v1208_v33, 0.0001  ;;  %v337_v41 = vmul.f32 %v1133_v37, %v321_v32  ;;  %v314_v24 = vmax.f32 %v1258_v16, 0.0001  ;;  %p881_p3 = por %p880_p2, %p879_p1 }
  0xc0   :  { %v225_v38 = vpop.permute.xlu1 %224  ;;  %195 = vadd.xlane.f32.xlu1 %v194_v39  ;;  %v342_v7 = vmul.f32 %v1152_v50, %v326_v57  ;;  %v252_v50 = vpop.permute.xlu0 %251  ;;  %v344_v28 = vmul.f32 %v1176_v6, %v328_v8 }
  0xc1   :  { %v322_v42 = vmin.f32 %v306_v22, 0.9999  ;;  %vm259_vm8 = vcmp.eq.s32.totalorder %v1140_v26, %v225_v38  ;;  %359 = vadd.xlane.f32.xlu0 %v358_v40  ;;  %v361_v37 = vsel %vm58_vm0, %v337_v41, 0.0  ;;  %vm268_vm15 = vcmp.eq.s32.totalorder %v1140_v26, %v252_v50  ;;  %p882_p4 = pnand %p881_p3, %p875_p0 }
  0xc2   :  { %v1223_v43 = vsel %vm259_vm8, 1.0, %v919_v51  ;;  %v376_v23 = vsel %vm58_vm0, %v342_v7, 0.0  ;;  %v330_v6 = vmin.f32 %v314_v24, 0.9999  ;;  %v382_v40 = vsel %vm58_vm0, %v344_v28, 0.0 }
  0xc3   :  { %v307_v25 = vmax.f32 %v1223_v43, 0.0001  ;;  %v338_v49 = vmul.f32 %v1131_v36, %v322_v42  ;;  %v770_v42 = vsel %vm268_vm15, 1.0, %v919_v51  ;;  %v540_v7 = vmul.f32 %v1278_v21, %v1214_v27 }
  0xc4   :  { %v228_v48 = vpop.permute.xlu1 %227  ;;  %198 = vadd.xlane.f32.xlu1 %v197_v45  ;;  %v346_v53 = vmul.f32 %v1203_v31, %v330_v6  ;;  %v533_v31 = vmul.f32 %v1278_v21, %v1166_v59 }
  0xc5   :  { %v323_v55 = vmin.f32 %v307_v25, 0.9999  ;;  %vm260_vm10 = vcmp.eq.s32.totalorder %v1140_v26, %v228_v48  ;;  %362 = vadd.xlane.f32.xlu0 %v361_v37  ;;  %v364_v15 = vsel %vm58_vm0, %v338_v49, 0.0  ;;  %v316_v48 = vmax.f32 %v770_v42, 0.0001 }
  0xc6   :  { %v1237_v56 = vsel %vm260_vm10, 1.0, %v919_v51  ;;  %v388_v58 = vsel %vm58_vm0, %v346_v53, 0.0 }
  0xc7   :  { %v308_v60 = vmax.f32 %v1237_v56, 0.0001  ;;  %v339_v1 = vmul.f32 %v1147_v47, %v323_v55  ;;  %v332_v55 = vmin.f32 %v316_v48, 0.9999 }
  0xc8   :  { %v231_v36 = vpop.permute.xlu1 %230  ;;  %350 = vadd.xlane.f32.xlu1 %v349_v63  ;;  %v536_v63 = vmul.f32 %v1278_v21, %v1208_v33  ;;  %v537_v33 = vmul.f32 %v1278_v21, %v1223_v43 }
  0xc9   :  { %v324_v0 = vmin.f32 %v308_v60, 0.9999  ;;  %vm261_vm11 = vcmp.eq.s32.totalorder %v1140_v26, %v231_v36  ;;  %365 = vadd.xlane.f32.xlu0 %v364_v15  ;;  %v367_v47 = vsel %vm58_vm0, %v339_v1, 0.0  ;;  %v348_v36 = vmul.f32 %v1244_v3, %v332_v55 }
  0xca   :  { %v1249_v4 = vsel %vm261_vm11, 1.0, %v919_v51  ;;  %v562_v59 = vsel %vm58_vm0, %v536_v63, 0.0  ;;  %v535_v3 = vmul.f32 %v1278_v21, %v1195_v13  ;;  %v565_v8 = vsel %vm58_vm0, %v537_v33, 0.0 }
  0xcb   :  { %v309_v2 = vmax.f32 %v1249_v4, 0.0001  ;;  %v340_v10 = vmul.f32 %v1142_v44, %v324_v0  ;;  %v394_v15 = vsel %vm58_vm0, %v348_v36, 0.0  ;;  %v538_v0 = vmul.f32 %v1278_v21, %v1237_v56 }
  0xcc   :  { %v237_v12 = vpop.permute.xlu1 %236  ;;  %201 = vadd.xlane.f32.xlu1 %v200_v9  ;;  %v574_v13 = vsel %vm58_vm0, %v540_v7, 0.0  ;;  %v539_v56 = vmul.f32 %v1278_v21, %v1249_v4  ;;  %v544_v9 = vmul.f32 %v1278_v21, %v1258_v16 }
  0xcd   :  { %v325_v19 = vmin.f32 %v309_v2, 0.9999  ;;  %vm263_vm13 = vcmp.eq.s32.totalorder %v1140_v26, %v237_v12  ;;  %368 = vadd.xlane.f32.xlu0 %v367_v47  ;;  %v370_v44 = vsel %vm58_vm0, %v340_v10, 0.0  ;;  %v559_v2 = vsel %vm58_vm0, %v535_v3, 0.0 }
  0xce   :  { %v1262_v20 = vsel %vm263_vm13, 1.0, %v919_v51  ;;  %v542_v12 = vmul.f32 %v1278_v21, %v1233_v30  ;;  %v571_v47 = vsel %vm58_vm0, %v539_v56, 0.0  ;;  %v586_v4 = vsel %vm58_vm0, %v544_v9, 0.0 }
  0xcf   :  { %v311_v14 = vmax.f32 %v1262_v20, 0.0001  ;;  %v341_v18 = vmul.f32 %v1159_v54, %v325_v19  ;;  %v531_v54 = vmul.f32 %v1278_v21, %v1187_v11  ;;  %v541_v27 = vmul.f32 %v1278_v21, %v1262_v20 }
  0xd0   :  { %v243_v17 = vpop.permute.xlu1 %242  ;;  %377 = vadd.xlane.f32.xlu1 %v376_v23  ;;  %v580_v43 = vsel %vm58_vm0, %v542_v12, 0.0  ;;  %v546_v19 = vmul.f32 %v1278_v21, %v770_v42 }
  0xd1   :  { %v327_v32 = vmin.f32 %v311_v14, 0.9999  ;;  %vm265_vm14 = vcmp.eq.s32.totalorder %v1140_v26, %v243_v17  ;;  %371 = vadd.xlane.f32.xlu0 %v370_v44  ;;  %v373_v39 = vsel %vm58_vm0, %v341_v18, 0.0  ;;  %v547_v11 = vsel %vm58_vm0, %v531_v54, 0.0 }
  0xd2   :  { %v1273_v35 = vsel %vm265_vm14, 1.0, %v919_v51  ;;  %v577_v10 = vsel %vm58_vm0, %v541_v27, 0.0  ;;  %v592_v20 = vsel %vm58_vm0, %v546_v19, 0.0 }
  0xd3   :  { %v313_v22 = vmax.f32 %v1273_v35, 0.0001  ;;  %v343_v41 = vmul.f32 %v1170_v62, %v327_v32  ;;  %v543_v30 = vmul.f32 %v1278_v21, %v1273_v35 }
  0xd4   :  { %v249_v38 = vpop.permute.xlu1 %248  ;;  %383 = vadd.xlane.f32.xlu1 %v382_v40 }
  0xd5   :  { %v329_v45 = vmin.f32 %v313_v22, 0.9999  ;;  %vm267_vm1 = vcmp.eq.s32.totalorder %v1140_v26, %v249_v38  ;;  %374 = vadd.xlane.f32.xlu0 %v373_v39  ;;  %v379_v37 = vsel %vm58_vm0, %v343_v41, 0.0  ;;  %v532_v26 = vmul.f32 %v1278_v21, %v1155_v52 }
  0xd6   :  { %v769_v46 = vsel %vm267_vm1, 1.0, %v919_v51  ;;  %v553_v52 = vsel %vm58_vm0, %v533_v31, 0.0  ;;  %v583_v50 = vsel %vm58_vm0, %v543_v30, 0.0 }
  0xd7   :  { %v315_v25 = vmax.f32 %v769_v46, 0.0001  ;;  %v345_v49 = vmul.f32 %v1183_v29, %v329_v45  ;;  %v550_v61 = vsel %vm58_vm0, %v532_v26, 0.0  ;;  %v545_v14 = vmul.f32 %v1278_v21, %v769_v46 }
  0xd8   :  { %548 = vadd.xlane.f32.xlu1 %v547_v11 }
  0xd9   :  { %v331_v62 = vmin.f32 %v315_v25, 0.9999  ;;  %380 = vadd.xlane.f32.xlu0 %v379_v37  ;;  %v385_v57 = vsel %vm58_vm0, %v345_v49, 0.0  ;;  %v589_v16 = vsel %vm58_vm0, %v545_v14, 0.0 }
  0xdb   :  { %v347_v60 = vmul.f32 %v1210_v34, %v331_v62  ;;  %v534_v34 = vmul.f32 %v1278_v21, %v1181_v5  ;;  %v568_v5 = vsel %vm58_vm0, %v538_v0, 0.0 }
  0xdc   :  { %389 = vadd.xlane.f32.xlu1 %v388_v58 }
  0xdd   :  { %386 = vadd.xlane.f32.xlu0 %v385_v57  ;;  %v391_v29 = vsel %vm58_vm0, %v347_v60, 0.0  ;;  %v556_v1 = vsel %vm58_vm0, %v534_v34, 0.0 }
  0xe0   :  { %392 = vadd.xlane.f32.xlu1 %v391_v29 }
  0xe1   :  { %551 = vadd.xlane.f32.xlu0 %v550_v61 }
  0xe4   :  { %395 = vadd.xlane.f32.xlu1 %v394_v15 }
  0xe5   :  { %554 = vadd.xlane.f32.xlu0 %v553_v52 }
  0xe8   :  { %563 = vadd.xlane.f32.xlu1 %v562_v59 }
  0xe9   :  { %557 = vadd.xlane.f32.xlu0 %v556_v1 }
  0xec   :  { %569 = vadd.xlane.f32.xlu1 %v568_v5 }
  0xed   :  { %560 = vadd.xlane.f32.xlu0 %v559_v2 }
  0xf0   :  { %575 = vadd.xlane.f32.xlu1 %v574_v13 }
  0xf1   :  { %566 = vadd.xlane.f32.xlu0 %v565_v8 }
  0xf4   :  { %581 = vadd.xlane.f32.xlu1 %v580_v43 }
  0xf5   :  { %572 = vadd.xlane.f32.xlu0 %v571_v47 }
  0xf8   :  { %587 = vadd.xlane.f32.xlu1 %v586_v4 }
  0xf9   :  { %578 = vadd.xlane.f32.xlu0 %v577_v10 }
  0xfc   :  { %593 = vadd.xlane.f32.xlu1 %v592_v20 }
  0xfd   :  { %584 = vadd.xlane.f32.xlu0 %v583_v50 }
 0x101   :  { %590 = vadd.xlane.f32.xlu0 %v589_v16 }
 0x129   :  { %v157_v23 = vpop.xlane.xlu1 %156 }
 0x12d   :  { %v166_v24 = vpop.xlane.xlu1 %165 }
 0x12e   :  { %v160_v17 = vpop.xlane.xlu0 %159 }
 0x12f   :  { %810 = vrcp.f32 %v160_v17 }
 0x131   :  { %v172_v44 = vpop.xlane.xlu1 %171 }
 0x132   :  { %v163_v18 = vpop.xlane.xlu0 %162 }
 0x133   :  { %812 = vrcp.f32 %v163_v18 }
 0x134   :  { %814 = vrcp.f32 %v166_v24 }
 0x135   :  { %v178_v28 = vpop.xlane.xlu1 %177 }
 0x136   :  { %v169_v32 = vpop.xlane.xlu0 %168 }
 0x137   :  { %816 = vrcp.f32 %v169_v32 }
 0x138   :  { %818 = vrcp.f32 %v157_v23 }
 0x139   :  { %v184_v35 = vpop.xlane.xlu1 %183  ;;  %820 = vrcp.f32 %v172_v44 }
 0x13a   :  { %v175_v21 = vpop.xlane.xlu0 %174 }
 0x13b   :  { %822 = vrcp.f32 %v175_v21 }
 0x13c   :  { %v811_v40 = vpop.eup %810  ;;  %824 = vrcp.f32 %v178_v28 }
 0x13d   :  { %v187_v22 = vpop.xlane.xlu1 %186  ;;  %826 = vrcp.f32 %v184_v35 }
 0x13e   :  { %v181_v54 = vpop.xlane.xlu0 %180 }
 0x13f   :  { %828 = vrcp.f32 %v181_v54 }
 0x140   :  { %v813_v46 = vpop.eup %812 }
 0x141   :  { %v190_v6 = vpop.xlane.xlu1 %189  ;;  %v815_v25 = vpop.eup %814 }
 0x142   :  { %v354_v38 = vpop.xlane.xlu0 %353  ;;  %830 = vrcp.f32 %v190_v6 }
 0x143   :  { %v400_v45 = vmul.f32 %v811_v40, %v354_v38 }
 0x144   :  { %v817_v62 = vpop.eup %816 }
 0x145   :  { %v193_v51 = vpop.xlane.xlu1 %192  ;;  %v1346_v49 = vadd.f32 1e-10, %v400_v45  ;;  %v819_v26 = vpop.eup %818 }
 0x146   :  { %v357_v39 = vpop.xlane.xlu0 %356  ;;  %v821_v61 = vpop.eup %820 }
 0x147   :  { %v402_v11 = vmul.f32 %v813_v46, %v357_v39  ;;  %832 = vlog2.f32 %v1346_v49  ;;  %v478_v50 = vsub.f32 1.0, %v1346_v49 }
 0x148   :  { %834 = vrcp.f32 %v187_v22  ;;  %v823_v1 = vpop.eup %822 }
 0x149   :  { %v196_v41 = vpop.xlane.xlu1 %195  ;;  %v1348_v55 = vadd.f32 1e-10, %v402_v11  ;;  %836 = vrcp.f32 %v193_v51  ;;  %v825_v0 = vpop.eup %824  ;;  %v494_v22 = vmul.f32 %v478_v50, %v478_v50 }
 0x14a   :  { %v360_v42 = vpop.xlane.xlu0 %359  ;;  %v827_v2 = vpop.eup %826 }
 0x14b   :  { %v404_v53 = vmul.f32 %v815_v25, %v360_v42  ;;  %838 = vlog2.f32 %v1348_v55  ;;  %v479_v14 = vsub.f32 1.0, %v1348_v55 }
 0x14c   :  { %v829_v12 = vpop.eup %828 }
 0x14d   :  { %v199_v48 = vpop.xlane.xlu1 %198  ;;  %v1351_v29 = vadd.f32 1e-10, %v404_v53  ;;  %v495_v39 = vmul.f32 %v479_v14, %v479_v14 }
 0x14e   :  { %v363_v37 = vpop.xlane.xlu0 %362 }
 0x14f   :  { %v406_v57 = vmul.f32 %v817_v62, %v363_v37  ;;  %840 = vlog2.f32 %v1351_v29  ;;  %v831_v27 = vpop.eup %830  ;;  %v480_v54 = vsub.f32 1.0, %v1351_v29 }
 0x151   :  { %v351_v60 = vpop.xlane.xlu1 %350  ;;  %v1354_v15 = vadd.f32 1e-10, %v406_v57 }
 0x152   :  { %v366_v58 = vpop.xlane.xlu0 %365  ;;  %v398_v31 = vmul.f32 %v819_v26, %v351_v60  ;;  %v496_v26 = vmul.f32 %v480_v54, %v480_v54 }
 0x153   :  { %v408_v36 = vmul.f32 %v821_v61, %v366_v58  ;;  %v481_v11 = vsub.f32 1.0, %v1354_v15 }
 0x154   :  { %v429_v52 = vadd.f32 1e-10, %v398_v31  ;;  %v833_v10 = vpop.eup %832 }
 0x155   :  { %v202_v63 = vpop.xlane.xlu1 %201  ;;  %v1357_v59 = vadd.f32 1e-10, %v408_v36  ;;  %v835_v19 = vpop.eup %834  ;;  %v448_v18 = vmul.f32 0.6931472, %v833_v10 }
 0x156   :  { %v369_v34 = vpop.xlane.xlu0 %368  ;;  %842 = vlog2.f32 %v429_v52  ;;  %v837_v20 = vpop.eup %836  ;;  %v477_v16 = vsub.f32 1.0, %v429_v52 }
 0x157   :  { %v410_v3 = vmul.f32 %v823_v1, %v369_v34  ;;  %844 = vrcp.f32 %v196_v41  ;;  %v510_v25 = vmul.f32 %v494_v22, %v448_v18  ;;  %v482_v55 = vsub.f32 1.0, %v1357_v59 }
 0x158   :  { %846 = vlog2.f32 %v1354_v15  ;;  %v839_v44 = vpop.eup %838  ;;  %v493_v41 = vmul.f32 %v477_v16, %v477_v16  ;;  %v497_v34 = vmul.f32 %v481_v11, %v481_v11 }
 0x159   :  { %v1360_v5 = vadd.f32 1e-10, %v410_v3  ;;  %v378_v7 = vpop.xlane.xlu1 %377  ;;  %848 = vlog2.f32 %v1357_v59  ;;  %v450_v51 = vmul.f32 0.6931472, %v839_v44 }
 0x15a   :  { %v372_v33 = vpop.xlane.xlu0 %371  ;;  %v416_v13 = vmul.f32 %v827_v2, %v378_v7  ;;  %850 = vrcp.f32 %v199_v48 }
 0x15b   :  { %v412_v8 = vmul.f32 %v825_v0, %v372_v33  ;;  %852 = vlog2.f32 %v1360_v5  ;;  %v511_v60 = vmul.f32 %v495_v39, %v450_v51 }
 0x15c   :  { %v1366_v9 = vadd.f32 1e-10, %v416_v13  ;;  %v841_v32 = vpop.eup %840  ;;  %v498_v13 = vmul.f32 %v482_v55, %v482_v55 }
 0x15d   :  { %v1363_v56 = vadd.f32 1e-10, %v412_v8  ;;  %v384_v43 = vpop.xlane.xlu1 %383  ;;  %v452_v37 = vmul.f32 0.6931472, %v841_v32 }
 0x15e   :  { %v375_v47 = vpop.xlane.xlu0 %374  ;;  %v420_v30 = vmul.f32 %v831_v27, %v384_v43 }
 0x15f   :  { %854 = vlog2.f32 %v1363_v56  ;;  %v414_v4 = vmul.f32 %v829_v12, %v375_v47  ;;  %v512_v3 = vmul.f32 %v496_v26, %v452_v37  ;;  %v484_v33 = vsub.f32 1.0, %v1363_v56 }
 0x160   :  { %856 = vrcp.f32 %v202_v63  ;;  %v1377_v35 = vadd.f32 1e-10, %v420_v30  ;;  %v483_v63 = vsub.f32 1.0, %v1360_v5 }
 0x161   :  { %v1371_v23 = vadd.f32 1e-10, %v414_v4  ;;  %v1373_v17 = vpop.xlane.xlu1 %548  ;;  %858 = vlog2.f32 %v1366_v9  ;;  %v500_v16 = vmul.f32 %v484_v33, %v484_v33 }
 0x162   :  { %v381_v24 = vpop.xlane.xlu0 %380  ;;  %v499_v10 = vmul.f32 %v483_v63, %v483_v63  ;;  %v488_v11 = vsub.f32 1.0, %v1377_v35 }
 0x163   :  { %v418_v28 = vmul.f32 %v835_v19, %v381_v24  ;;  %860 = vlog2.f32 %v1371_v23  ;;  %v843_v21 = vpop.eup %842  ;;  %v485_v4 = vsub.f32 1.0, %v1371_v23  ;;  %v486_v24 = vsub.f32 1.0, %v1366_v9 }
 0x164   :  { %v845_v38 = vpop.eup %844  ;;  %v446_v40 = vmul.f32 0.6931472, %v843_v21 }
 0x165   :  { %v1380_v6 = vadd.f32 1e-10, %v418_v28  ;;  %v390_v45 = vpop.xlane.xlu1 %389  ;;  %v847_v46 = vpop.eup %846  ;;  %v501_v23 = vmul.f32 %v485_v4, %v485_v4 }
 0x166   :  { %v387_v42 = vpop.xlane.xlu0 %386  ;;  %v509_v49 = vmul.f32 %v493_v41, %v446_v40  ;;  %v424_v53 = vmul.f32 %v845_v38, %v390_v45  ;;  %v849_v62 = vpop.eup %848  ;;  %v454_v61 = vmul.f32 0.6931472, %v847_v46  ;;  %v502_v46 = vmul.f32 %v486_v24, %v486_v24 }
 0x167   :  { %862 = vlog2.f32 %v1380_v6  ;;  %v422_v48 = vmul.f32 %v837_v20, %v387_v42  ;;  %v851_v58 = vpop.eup %850  ;;  %v456_v0 = vmul.f32 0.6931472, %v849_v62  ;;  %v487_v38 = vsub.f32 1.0, %v1380_v6 }
 0x168   :  { %864 = vlog2.f32 %v1377_v35  ;;  %v704_v29 = vadd.f32 %v510_v25, %v509_v49  ;;  %v1388_v31 = vadd.f32 1e-10, %v424_v53  ;;  %v853_v15 = vpop.eup %852  ;;  %v513_v8 = vmul.f32 %v497_v34, %v454_v61 }
 0x169   :  { %v1386_v57 = vadd.f32 1e-10, %v422_v48  ;;  %v393_v52 = vpop.xlane.xlu1 %392  ;;  %v458_v47 = vmul.f32 0.6931472, %v853_v15  ;;  %v514_v19 = vmul.f32 %v498_v13, %v456_v0 }
 0x16a   :  { %v552_v36 = vpop.xlane.xlu0 %551  ;;  %v426_v1 = vmul.f32 %v851_v58, %v393_v52  ;;  %v705_v59 = vadd.f32 %v704_v29, %v511_v60  ;;  %v503_v60 = vmul.f32 %v487_v38, %v487_v38  ;;  %v490_v29 = vsub.f32 1.0, %v1388_v31 }
 0x16b   :  { %866 = vlog2.f32 %v1386_v57  ;;  %v679_v44 = vadd.f32 %v552_v36, %v1373_v17  ;;  %v515_v18 = vmul.f32 %v499_v10, %v458_v47  ;;  %v489_v53 = vsub.f32 1.0, %v1386_v57 }
 0x16c   :  { %868 = vlog2.f32 %v1388_v31  ;;  %v855_v2 = vpop.eup %854  ;;  %v1394_v7 = vadd.f32 1e-10, %v426_v1  ;;  %v706_v12 = vadd.f32 %v705_v59, %v512_v3  ;;  %v504_v52 = vmul.f32 %v488_v11, %v488_v11 }
 0x16d   :  { %v396_v27 = vpop.xlane.xlu1 %395  ;;  %v857_v5 = vpop.eup %856  ;;  %v460_v20 = vmul.f32 0.6931472, %v855_v2  ;;  %v505_v3 = vmul.f32 %v489_v53, %v489_v53  ;;  %v506_v13 = vmul.f32 %v490_v29, %v490_v29 }
 0x16e   :  { %v555_v43 = vpop.xlane.xlu0 %554  ;;  %870 = vlog2.f32 %v1394_v7  ;;  %v859_v30 = vpop.eup %858  ;;  %v707_v50 = vadd.f32 %v706_v12, %v513_v8  ;;  %v428_v14 = vmul.f32 %v857_v5, %v396_v27  ;;  %v491_v8 = vsub.f32 1.0, %v1394_v7 }
 0x16f   :  { %v680_v51 = vadd.f32 %v679_v44, %v555_v43  ;;  %v516_v41 = vmul.f32 %v500_v16, %v460_v20  ;;  %v464_v42 = vmul.f32 0.6931472, %v859_v30 }
 0x170   :  { %v861_v56 = vpop.eup %860  ;;  %v708_v28 = vadd.f32 %v707_v50, %v514_v19  ;;  %v444_v21 = vadd.f32 1e-10, %v428_v14  ;;  %v507_v19 = vmul.f32 %v491_v8, %v491_v8 }
 0x171   :  { %v462_v32 = vmul.f32 0.6931472, %v861_v56  ;;  %v564_v54 = vpop.xlane.xlu1 %563  ;;  %v518_v26 = vmul.f32 %v502_v46, %v464_v42 }
 0x172   :  { %v558_v22 = vpop.xlane.xlu0 %557  ;;  %v709_v40 = vadd.f32 %v708_v28, %v515_v18  ;;  %872 = vlog2.f32 %v444_v21  ;;  %v492_v27 = vsub.f32 1.0, %v444_v21 }
 0x173   :  { %v681_v9 = vadd.f32 %v680_v51, %v558_v22  ;;  %v517_v17 = vmul.f32 %v501_v23, %v462_v32 }
 0x174   :  { %v863_v39 = vpop.eup %862  ;;  %v710_v25 = vadd.f32 %v709_v40, %v516_v41  ;;  %v508_v44 = vmul.f32 %v492_v27, %v492_v27 }
 0x175   :  { %v865_v45 = vpop.eup %864  ;;  %v466_v48 = vmul.f32 0.6931472, %v863_v39  ;;  %v570_v49 = vpop.xlane.xlu1 %569 }
 0x176   :  { %v561_v37 = vpop.xlane.xlu0 %560  ;;  %v711_v55 = vadd.f32 %v710_v25, %v517_v17  ;;  %v468_v58 = vmul.f32 0.6931472, %v865_v45 }
 0x177   :  { %v682_v62 = vadd.f32 %v681_v9, %v561_v37  ;;  %v519_v15 = vmul.f32 %v503_v60, %v466_v48  ;;  %v703_v37 = vld [vmem:[#allocation4] sm:$0x1] }
 0x178   :  { %v867_v6 = vpop.eup %866  ;;  %v712_v34 = vadd.f32 %v711_v55, %v518_v26  ;;  %v520_v57 = vmul.f32 %v504_v52, %v468_v58 }
 0x179   :  { %v869_v61 = vpop.eup %868  ;;  %v683_v36 = vadd.f32 %v682_v62, %v564_v54  ;;  %v470_v63 = vmul.f32 0.6931472, %v867_v6  ;;  %v576_v1 = vpop.xlane.xlu1 %575 }
 0x17a   :  { %v567_v35 = vpop.xlane.xlu0 %566  ;;  %v713_v2 = vadd.f32 %v712_v34, %v519_v15  ;;  %v472_v33 = vmul.f32 0.6931472, %v869_v61 }
 0x17b   :  { %v684_v0 = vadd.f32 %v683_v36, %v567_v35  ;;  %v871_v59 = vpop.eup %870  ;;  %v521_v47 = vmul.f32 %v505_v3, %v470_v63 }
 0x17c   :  { %v714_v43 = vadd.f32 %v713_v2, %v520_v57  ;;  %v474_v31 = vmul.f32 0.6931472, %v871_v59  ;;  %v522_v30 = vmul.f32 %v506_v13, %v472_v33 }
 0x17d   :  { %v685_v12 = vadd.f32 %v684_v0, %v570_v49  ;;  %v582_v50 = vpop.xlane.xlu1 %581 }
 0x17e   :  { %v573_v5 = vpop.xlane.xlu0 %572  ;;  %v715_v4 = vadd.f32 %v714_v43, %v521_v47  ;;  %v523_v16 = vmul.f32 %v507_v19, %v474_v31 }
 0x17f   :  { %v686_v10 = vadd.f32 %v685_v12, %v573_v5  ;;  %v873_v20 = vpop.eup %872 }
 0x180   :  { %v716_v56 = vadd.f32 %v715_v4, %v522_v30  ;;  %v476_v24 = vmul.f32 0.6931472, %v873_v20 }
 0x181   :  { %v687_v14 = vadd.f32 %v686_v10, %v576_v1  ;;  %v588_v23 = vpop.xlane.xlu1 %587 }
 0x182   :  { %v579_v18 = vpop.xlane.xlu0 %578  ;;  %v717_v28 = vadd.f32 %v716_v56, %v523_v16  ;;  %v524_v32 = vmul.f32 %v508_v44, %v476_v24 }
 0x183   :  { %v688_v7 = vadd.f32 %v687_v14, %v579_v18 }
 0x184   :  { %v718_v54 = vadd.f32 %v717_v28, %v524_v32 }
 0x185   :  { %v689_v22 = vadd.f32 %v688_v7, %v582_v50  ;;  %v594_v46 = vpop.xlane.xlu1 %593 }
 0x186   :  { %v585_v21 = vpop.xlane.xlu0 %584  ;;  %v719_v51 = vrot.slane %v718_v54, 4 }
 0x187   :  { %v690_v38 = vadd.f32 %v689_v22, %v585_v21 }
 0x188   :  { %v720_v40 = vadd.f32 %v719_v51, %v718_v54 }
 0x189   :  { %v691_v39 = vadd.f32 %v690_v38, %v588_v23 }
 0x18a   :  { %v591_v41 = vpop.xlane.xlu0 %590  ;;  %v721_v45 = vrot.slane %v720_v40, 2 }
 0x18b   :  { %v692_v42 = vadd.f32 %v691_v39, %v591_v41 }
 0x18c   :  { %v722_v25 = vadd.f32 %v721_v45, %v720_v40 }
 0x18d   :  { %v693_v9 = vadd.f32 %v692_v42, %v594_v46 }
 0x18e   :  { %v723_v11 = vrot.slane %v722_v25, 1 }
 0x18f   :  { %v694_v17 = vrot.slane %v693_v9, 4 }
 0x190   :  { %v724_v49 = vadd.f32 %v723_v11, %v722_v25 }
 0x191   :  { %v695_v48 = vadd.f32 %v694_v17, %v693_v9 }
 0x192   :  { %v725_v62 = vadd.f32 %v724_v49, %v703_v37 }
 0x193   :  { %v696_v53 = vrot.slane %v695_v48, 2 }
 0x194   :  { %726 = vst.msk [vmem:[#allocation4] sm:$0x1] %vm22_vm2, %v725_v62 }
 0x195   :  { %v697_v6 = vadd.f32 %v696_v53, %v695_v48 }
 0x197   :  { %v698_v26 = vrot.slane %v697_v6, 1 }
 0x198   :  { %885 = shalt.err (!%p882_p4)
}
 0x199   :  { %746 = dma.vmem_to_hbm [thread:$0]  %s744_s26, 16, %s1417_s4, [#allocation5]   ;;  %v678_v55 = vld [vmem:[#allocation2] sm:$0x1]  ;;  %v699_v58 = vadd.f32 %v698_v26, %v697_v6 }
 0x19a   :  { %s921_s5 = smov [#allocation2]  }
 0x19b   :  { %s733_s6 = sshll.u32 %s921_s5, 4  ;;  %v700_v60 = vadd.f32 %v699_v58, %v678_v55  ;;  %s734_s6 = int_to_ptr.vmem [resolvable:$true] %s733_s6 }
 0x19c   :  { %s894_s7 = scalar_lea.vmem %s734_s6, 16  ;;  %s898_s8 = scalar_lea.vmem %s734_s6, 32 }
 0x19d   :  { %702 = vst.msk [vmem:[#allocation2] sm:$0x1] %vm22_vm2, %v700_v60  ;;  %p895_p5 = scmp.ne.s32.totalorder %s734_s6, %s894_s7  ;;  %p899_p6 = scmp.lt.s32.totalorder %s734_s6, %s734_s6 }
 0x19e   :  { %p900_p7 = scmp.lt.s32.totalorder %s898_s8, %s894_s7 }
 0x1a0   :  { %p901_p8 = por %p900_p7, %p899_p6 }
 0x1a2   :  { %p902_p9 = pnand %p901_p8, %p895_p5 }
 0x1a4   :  { %905 = shalt.err (!%p902_p9)
}
 0x1a5   :  { %736 = dma.vmem_to_hbm [thread:$0]  %s734_s6, 16, %s1416_s3, [#allocation3]  }
 0x1a6   :  { %914 = dma.done.wait [#allocation3], 16  }
 0x1a7   :  { %915 = vsyncadd [#allocation3], 4294967280 }
 0x1a8   :  { %916 = dma.done.wait [#allocation5], 16  }
 0x1a9   :  { %917 = vsyncadd [#allocation5], 4294967280 }
 0x1aa   :  { %753 = vsyncpa [#allocation3], 1 }
 0x1ab   :  { %754 = vsyncpa [#allocation5], 1 }

</bundles_post_ra>
